<compile_context>
chip_gen: v6e
topology: v6e:2x2x1
jax: 0.10.0
libtpu: 0.0.40
codegen_flags: <defaults>
</compile_context>

<pallas_src>
import jax
import jax.numpy as jnp
from jax.experimental import pallas as pl
from jax.experimental.pallas import tpu as pltpu


def policy_kernel(state_ref, w1_ref, b1_ref, w2_ref, b2_ref,
                  wm_ref, bm_ref, mean_ref):
    # layer 1: (TB, obs) @ (obs, hidden) + (1, hidden) -> tanh   (f32 elementwise)
    h1 = jnp.tanh(
        jnp.dot(state_ref[...], w1_ref[...], preferred_element_type=jnp.float32)
        + b1_ref[...]
    )
    # layer 2: (TB, hidden) @ (hidden, hidden) + (1, hidden) -> tanh
    h2 = jnp.tanh(
        jnp.dot(h1.astype(w2_ref.dtype), w2_ref[...],
                preferred_element_type=jnp.float32)
        + b2_ref[...]
    )
    # mean head: (TB, hidden) @ (hidden, ac) + (1, ac)
    mean_ref[...] = (
        jnp.dot(h2.astype(wm_ref.dtype), wm_ref[...],
                preferred_element_type=jnp.float32)
        + bm_ref[...]
    ).astype(mean_ref.dtype)


def _round_up(x, m):
    return ((x + m - 1) // m) * m


def policy_forward(state, params, *, tile_b=512, matmul_dtype=jnp.bfloat16):
    """Policy forward pass.

    Returns (mean, std) with mean: (B, ac) and std: (ac,) — matching the
    PyTorch module's (mean, self.log_std.exp()).

    tile_b:       batch tile size (clamped / rounded so small B still works).
    matmul_dtype: dtype of the MXU operands; accumulation and elementwise
                  stay f32.  Use jnp.float32 for exact-f32 math.
    """
    B, obs = state.shape
    ac = params["wm"].shape[1]

    # state-independent path: computed outside the kernel.
    std = jnp.exp(params["log_std"]).reshape(ac)

    # MXU operands; biases stay f32 (added to the f32 accumulator).
    x = state.astype(matmul_dtype)
    w1 = params["w1"].astype(matmul_dtype)
    w2 = params["w2"].astype(matmul_dtype)
    wm = params["wm"].astype(matmul_dtype)
    b1, b2, bm = params["b1"], params["b2"], params["bm"]

    # Batch tiling: TILE_B is a multiple of 8; pad B up to a multiple of it.
    TILE_B = min(tile_b, _round_up(B, 8))
    TILE_B = _round_up(TILE_B, 8)
    B_pad = _round_up(B, TILE_B)
    if B_pad != B:
        x = jnp.pad(x, ((0, B_pad - B), (0, 0)))

    grid = (B_pad // TILE_B,)

    def resident(a):
        # Same block every grid step -> Pallas keeps it VMEM-resident.
        return pl.BlockSpec(a.shape, lambda i: (0, 0))

    mean = pl.pallas_call(
        policy_kernel,
        out_shape=jax.ShapeDtypeStruct((B_pad, ac), jnp.float32),
        grid=grid,
        in_specs=[
            pl.BlockSpec((TILE_B, obs), lambda i: (i, 0)),   # state: tiled over batch
            resident(w1), resident(b1),
            resident(w2), resident(b2),
            resident(wm), resident(bm),
        ],
        out_specs=pl.BlockSpec((TILE_B, ac), lambda i: (i, 0)),
        compiler_params=pltpu.CompilerParams(
            dimension_semantics=("parallel",),               # megacore on v7x
        ),
    )(x, w1, b1, w2, b2, wm, bm)

    return mean[:B], std


def init_params(key, obs, ac, hidden=64):
    """Deterministic synthetic parameter init (shapes match the nn.Module)."""
    ks = jax.random.split(key, 6)
    scale = 0.1
    return {
        # stored pre-transposed: (in, out)
        "w1": scale * jax.random.normal(ks[0], (obs, hidden), jnp.float32),
        "b1": scale * jax.random.normal(ks[1], (1, hidden), jnp.float32),
        "w2": scale * jax.random.normal(ks[2], (hidden, hidden), jnp.float32),
        "b2": scale * jax.random.normal(ks[3], (1, hidden), jnp.float32),
        "wm": scale * jax.random.normal(ks[4], (hidden, ac), jnp.float32),
        "bm": scale * jax.random.normal(ks[5], (1, ac), jnp.float32),
        # nn.Parameter(torch.zeros(ac))
        "log_std": jnp.zeros((1, ac), jnp.float32),
    }


def policy_forward_ref(state, params):
    h1 = jnp.tanh(state @ params["w1"] + params["b1"])
    h2 = jnp.tanh(h1 @ params["w2"] + params["b2"])
    mean = h2 @ params["wm"] + params["bm"]
    return mean, jnp.exp(params["log_std"]).reshape(-1)


if __name__ == "__main__":
    obs, ac, hidden = 32, 8, 64
    key = jax.random.PRNGKey(0)
    k_state, k_params = jax.random.split(key)
    params = init_params(k_params, obs, ac, hidden)

    # Case 1: tiny batch, exact f32 path -> tight check against reference.
    B = 8
    state = jax.random.normal(k_state, (B, obs), jnp.float32)
    mean32, std32 = policy_forward(state, params, matmul_dtype=jnp.float32)
    jax.block_until_ready((mean32, std32))
    mean_ref, std_ref = policy_forward_ref(state, params)
    assert mean32.shape == (B, ac) and std32.shape == (ac,)
    assert jnp.allclose(mean32, mean_ref, atol=1e-5, rtol=1e-5)
    assert jnp.allclose(std32, std_ref, atol=1e-6, rtol=1e-6)

    # Case 2: non-multiple batch with real tiling + bf16 MXU operands
    # (default fast path) -> bf16-level tolerance against the f32 reference.
    B2 = 200
    state2 = jax.random.normal(k_state, (B2, obs), jnp.float32)
    mean_bf, std_bf = policy_forward(state2, params, tile_b=64)
    jax.block_until_ready((mean_bf, std_bf))
    mean_ref2, std_ref2 = policy_forward_ref(state2, params)
    assert mean_bf.shape == (B2, ac) and std_bf.shape == (ac,)
    assert jnp.allclose(mean_bf, mean_ref2, atol=2e-2, rtol=2e-2)
    assert jnp.allclose(std_bf, std_ref2, atol=1e-6, rtol=1e-6)

    print("KERNEL_OK")
</pallas_src>

<mosaic_0001>
module attributes {stable_mosaic.version = 11 : i64} {
  func.func @policy_kernel(%arg0: i32, %arg1: memref<8x32xf32, #tpu.memory_space<vmem>>, %arg2: memref<32x64xf32, #tpu.memory_space<vmem>>, %arg3: memref<1x64xf32, #tpu.memory_space<vmem>>, %arg4: memref<64x64xf32, #tpu.memory_space<vmem>>, %arg5: memref<1x64xf32, #tpu.memory_space<vmem>>, %arg6: memref<64x8xf32, #tpu.memory_space<vmem>>, %arg7: memref<1x8xf32, #tpu.memory_space<vmem>>, %arg8: memref<8x8xf32, #tpu.memory_space<vmem>>) attributes {dimension_semantics = [#tpu.dimension_semantics<parallel>], iteration_bounds = array<i64: 1>, scalar_prefetch = 0 : i64, scratch_operands = 0 : i64, tpu.core_type = #tpu.core_type<tc>, window_params = [{transform_indices = @transform_0, window_bounds = array<i64: 8, 32>}, {pipeline_mode = #tpu.pipeline_mode<synchronous>, transform_indices = @transform_1, window_bounds = array<i64: 32, 64>}, {pipeline_mode = #tpu.pipeline_mode<synchronous>, transform_indices = @transform_2, window_bounds = array<i64: 1, 64>}, {pipeline_mode = #tpu.pipeline_mode<synchronous>, transform_indices = @transform_3, window_bounds = array<i64: 64, 64>}, {pipeline_mode = #tpu.pipeline_mode<synchronous>, transform_indices = @transform_4, window_bounds = array<i64: 1, 64>}, {pipeline_mode = #tpu.pipeline_mode<synchronous>, transform_indices = @transform_5, window_bounds = array<i64: 64, 8>}, {pipeline_mode = #tpu.pipeline_mode<synchronous>, transform_indices = @transform_6, window_bounds = array<i64: 1, 8>}, {transform_indices = @transform_7, window_bounds = array<i64: 8, 8>}]} {
    %c0 = arith.constant 0 : index
    %c0_0 = arith.constant 0 : index
    %0 = vector.load %arg1[%c0, %c0_0] : memref<8x32xf32, #tpu.memory_space<vmem>>, vector<8x32xf32>
    %c0_1 = arith.constant 0 : index
    %c0_2 = arith.constant 0 : index
    %1 = vector.load %arg2[%c0_1, %c0_2] : memref<32x64xf32, #tpu.memory_space<vmem>>, vector<32x64xf32>
    %cst = arith.constant dense<0.000000e+00> : vector<8x64xf32>
    %2 = tpu.matmul %0, %1, %cst {dimension_numbers = #tpu.dot_dimension_numbers<[1], [0], [0], [1], [0, 0, 1, 1], [], []>} : vector<8x32xf32>, vector<32x64xf32>, vector<8x64xf32> -> vector<8x64xf32>
    %c0_3 = arith.constant 0 : index
    %c0_4 = arith.constant 0 : index
    %3 = vector.load %arg3[%c0_3, %c0_4] : memref<1x64xf32, #tpu.memory_space<vmem>>, vector<1x64xf32>
    %4 = vector.broadcast %3 : vector<1x64xf32> to vector<8x64xf32>
    %5 = arith.addf %2, %4 : vector<8x64xf32>
    %6 = math.tanh %5 : vector<8x64xf32>
    %c0_5 = arith.constant 0 : index
    %c0_6 = arith.constant 0 : index
    %7 = vector.load %arg4[%c0_5, %c0_6] : memref<64x64xf32, #tpu.memory_space<vmem>>, vector<64x64xf32>
    %cst_7 = arith.constant dense<0.000000e+00> : vector<8x64xf32>
    %8 = tpu.matmul %6, %7, %cst_7 {dimension_numbers = #tpu.dot_dimension_numbers<[1], [0], [0], [1], [0, 0, 1, 1], [], []>} : vector<8x64xf32>, vector<64x64xf32>, vector<8x64xf32> -> vector<8x64xf32>
    %c0_8 = arith.constant 0 : index
    %c0_9 = arith.constant 0 : index
    %9 = vector.load %arg5[%c0_8, %c0_9] : memref<1x64xf32, #tpu.memory_space<vmem>>, vector<1x64xf32>
    %10 = vector.broadcast %9 : vector<1x64xf32> to vector<8x64xf32>
    %11 = arith.addf %8, %10 : vector<8x64xf32>
    %12 = math.tanh %11 : vector<8x64xf32>
    %c0_10 = arith.constant 0 : index
    %c0_11 = arith.constant 0 : index
    %13 = vector.load %arg6[%c0_10, %c0_11] : memref<64x8xf32, #tpu.memory_space<vmem>>, vector<64x8xf32>
    %cst_12 = arith.constant dense<0.000000e+00> : vector<8x8xf32>
    %14 = tpu.matmul %12, %13, %cst_12 {dimension_numbers = #tpu.dot_dimension_numbers<[1], [0], [0], [1], [0, 0, 1, 1], [], []>} : vector<8x64xf32>, vector<64x8xf32>, vector<8x8xf32> -> vector<8x8xf32>
    %c0_13 = arith.constant 0 : index
    %c0_14 = arith.constant 0 : index
    %15 = vector.load %arg7[%c0_13, %c0_14] : memref<1x8xf32, #tpu.memory_space<vmem>>, vector<1x8xf32>
    %16 = vector.broadcast %15 : vector<1x8xf32> to vector<8x8xf32>
    %17 = arith.addf %14, %16 : vector<8x8xf32>
    %c0_15 = arith.constant 0 : index
    %c0_16 = arith.constant 0 : index
    %18 = vector.load %arg8[%c0_15, %c0_16] : memref<8x8xf32, #tpu.memory_space<vmem>>, vector<8x8xf32>
    tpu.vector_store %arg8[%c0_15, %c0_16], %17 {strides = array<i32>} : memref<8x8xf32, #tpu.memory_space<vmem>>, vector<8x8xf32>,
    return
  }
  func.func @transform_0(%arg0: i32) -> (i32, i32) {
    %c0_i32 = arith.constant 0 : i32
    %c0_i32_0 = arith.constant 0 : i32
    return %arg0, %c0_i32 : i32, i32
  }
  func.func @transform_1(%arg0: i32) -> (i32, i32) {
    %c0_i32 = arith.constant 0 : i32
    %c0_i32_0 = arith.constant 0 : i32
    %c0_i32_1 = arith.constant 0 : i32
    return %c0_i32, %c0_i32_0 : i32, i32
  }
  func.func @transform_2(%arg0: i32) -> (i32, i32) {
    %c0_i32 = arith.constant 0 : i32
    %c0_i32_0 = arith.constant 0 : i32
    %c0_i32_1 = arith.constant 0 : i32
    return %c0_i32, %c0_i32_0 : i32, i32
  }
  func.func @transform_3(%arg0: i32) -> (i32, i32) {
    %c0_i32 = arith.constant 0 : i32
    %c0_i32_0 = arith.constant 0 : i32
    %c0_i32_1 = arith.constant 0 : i32
    return %c0_i32, %c0_i32_0 : i32, i32
  }
  func.func @transform_4(%arg0: i32) -> (i32, i32) {
    %c0_i32 = arith.constant 0 : i32
    %c0_i32_0 = arith.constant 0 : i32
    %c0_i32_1 = arith.constant 0 : i32
    return %c0_i32, %c0_i32_0 : i32, i32
  }
  func.func @transform_5(%arg0: i32) -> (i32, i32) {
    %c0_i32 = arith.constant 0 : i32
    %c0_i32_0 = arith.constant 0 : i32
    %c0_i32_1 = arith.constant 0 : i32
    return %c0_i32, %c0_i32_0 : i32, i32
  }
  func.func @transform_6(%arg0: i32) -> (i32, i32) {
    %c0_i32 = arith.constant 0 : i32
    %c0_i32_0 = arith.constant 0 : i32
    %c0_i32_1 = arith.constant 0 : i32
    return %c0_i32, %c0_i32_0 : i32, i32
  }
  func.func @transform_7(%arg0: i32) -> (i32, i32) {
    %c0_i32 = arith.constant 0 : i32
    %c0_i32_0 = arith.constant 0 : i32
    return %arg0, %c0_i32 : i32, i32
  }
}

</mosaic_0001>

<bundles_post_ra>
// kernel: tpu_custom_call.1
= control target key start
LH: loop header
LB: loop body
LE: loop exit
PB: predicated region body
PF: predicated region fallthrough
CT: control target
= control target key end

     0   :  { %12 = vsyncpa [#allocation3], 0  ;;  %s632_s0 = inlined_call_operand.vmem [shape: f32[8,32], index: 0, kind: input, shape index: {}]   ;;  %s633_s1 = inlined_call_operand.hbm [shape: f32[32,64], index: 1, kind: input, shape index: {}]   ;;  %s634_s2 = inlined_call_operand.vmem [shape: f32[1,64], index: 2, kind: input, shape index: {}]   ;;  %s635_s3 = inlined_call_operand.vmem [shape: f32[64,64], index: 3, kind: input, shape index: {}]   ;;  %s636_s4 = inlined_call_operand.hbm [shape: f32[1,64], index: 4, kind: input, shape index: {}]   ;;  %s637_s5 = inlined_call_operand.vmem [shape: f32[64,8], index: 5, kind: input, shape index: {}]   ;;  %s638_s6 = inlined_call_operand.vmem [shape: f32[1,8], index: 6, kind: input, shape index: {}]   ;;  %s639_s7 = inlined_call_operand.hbm [shape: f32[8,8], index: 7, kind: output, shape index: {}]  }
   0x1   :  { %13 = vsyncpa [#allocation6], 0 }
   0x2   :  { %14 = vsyncpa [#allocation4], 0  ;;  %s491_s24 = smov [#allocation2]  }
   0x3   :  { %s22_s25 = sshll.u32 %s491_s24, 4  ;;  %s23_s25 = int_to_ptr.vmem [resolvable:$true] %s22_s25 }
   0x4   :  { %s433_s26 = scalar_lea.vmem %s23_s25, 512  ;;  %p438_p1 = scmp.lt.s32.totalorder %s23_s25, %s23_s25 }
   0x5   :  { %p434_p0 = scmp.ne.s32.totalorder %s23_s25, %s433_s26  ;;  %p439_p2 = scmp.lt.s32.totalorder %s433_s26, %s433_s26 }
   0x7   :  { %p440_p3 = por %p439_p2, %p438_p1 }
   0x9   :  { %p441_p4 = pnand %p440_p3, %p434_p0 }
   0xb   :  { %444 = shalt.err (!%p441_p4)
}
   0xc   :  { %s492_s27 = smov 128   ;;  %s493_s28 = smov 8  }
   0xd   :  { %28 = dma.hbm_to_vmem [thread:$0]  %s633_s1, 512, %s23_s25, [#allocation3], %s492_s27, %s492_s27, %s493_s28  }
   0xe   :  { %s494_s8 = smov [#allocation5]  }
   0xf   :  { %s39_s9 = sshll.u32 %s494_s8, 4  ;;  %s40_s9 = int_to_ptr.vmem [resolvable:$true] %s39_s9 }
  0x10   :  { %s453_s10 = scalar_lea.vmem %s40_s9, 16  ;;  %s457_s11 = scalar_lea.vmem %s40_s9, 32 }
  0x11   :  { %p454_p5 = scmp.ne.s32.totalorder %s40_s9, %s453_s10  ;;  %p458_p6 = scmp.lt.s32.totalorder %s40_s9, %s40_s9 }
  0x12   :  { %p459_p7 = scmp.lt.s32.totalorder %s457_s11, %s453_s10 }
  0x14   :  { %p460_p8 = por %p459_p7, %p458_p6 }
  0x16   :  { %p461_p9 = pnand %p460_p8, %p454_p5 }
  0x18   :  { %464 = shalt.err (!%p461_p9)
}
  0x19   :  { %42 = dma.hbm_to_vmem [thread:$0]  %s636_s4, 16, %s40_s9, [#allocation6]  }
  0x1a   :  { %485 = dma.done.wait [#allocation3], 512  }
  0x1b   :  { %486 = vsyncadd [#allocation3], 4294966784 }
  0x1c   :  { %487 = dma.done.wait [#allocation6], 16  }
  0x1d   :  { %488 = vsyncadd [#allocation6], 4294967280  ;;  %v495_v0 = vmov 0.0   ;;  %vm496_vm0 = vmmov 0   ;;  %v57_v1 = vld [vmem:[#allocation2 + $0x18] sm:$0xff]  ;;  %v56_v2 = vld [vmem:[#allocation2 + $0x10] sm:$0xff] }
  0x1e   :  { %365 = vmatprep.subr.mxu0 %v495_v0  ;;  %373 = vmatprep.mubr.msk.f32.mxu0 %vm496_vm0, %v495_v0  ;;  %v55_v3 = vld [vmem:[#allocation2 + $0x8] sm:$0xff]  ;;  %v54_v4 = vld [vmem:[#allocation2] sm:$0xff]  ;;  %vm65_vm1 = vcmask 261120   ;;  %v147_v6 = vld [vmem:[%s635_s3 + $0x38] sm:$0xff]  ;;  %vm155_vm2 = vcmask 523264   ;;  %s497_s21 = smov [#allocation7]  }
  0x1f   :  { %376 = vmatprep.subr.mxu1 %v495_v0  ;;  %392 = vmatprep.mubr.msk.f32.mxu1 %vm496_vm0, %v495_v0  ;;  %v53_v5 = vld [vmem:[%s632_s0] sm:$0xff]  ;;  %v146_v7 = vld [vmem:[%s635_s3 + $0x30] sm:$0xff]  ;;  %v145_v8 = vld [vmem:[%s635_s3 + $0x28] sm:$0xff]  ;;  %s326_s22 = sshll.u32 %s497_s21, 4  ;;  %vm318_vm3 = vcmask 64512   ;;  %s327_s22 = int_to_ptr.vmem [resolvable:$true] %s326_s22 }
  0x20   :  { %366 = vmatpush3.msra.mxu0 %v57_v1  ;;  %377 = vmatpush3.msra.mxu1 %v147_v6  ;;  %v144_v9 = vld [vmem:[%s635_s3 + $0x20] sm:$0xff]  ;;  %v143_v10 = vld [vmem:[%s635_s3 + $0x18] sm:$0xff]  ;;  %v142_v11 = vld [vmem:[%s635_s3 + $0x10] sm:$0xff]  ;;  %p470_p11 = scmp.lt.s32.totalorder %s327_s22, %s327_s22 }
  0x21   :  { %367 = vmatprep.subr.mxu0 %v495_v0  ;;  %378 = vmatprep.subr.mxu1 %v495_v0  ;;  %v141_v12 = vld [vmem:[%s635_s3 + $0x8] sm:$0xff]  ;;  %v140_v13 = vld [vmem:[%s635_s3] sm:$0xff]  ;;  %v237_v19 = vld [vmem:[%s637_s5 + $0x38] sm:$0xff] }
  0x22   :  { %368 = vmatpush3.msra.mxu0 %v56_v2  ;;  %379 = vmatpush3.msra.mxu1 %v146_v7  ;;  %v336_v14 = vld [vmem:[%s634_s2] ss:$0 sm:$0xff]  ;;  %v236_v20 = vld [vmem:[%s637_s5 + $0x30] sm:$0xff]  ;;  %v235_v21 = vld [vmem:[%s637_s5 + $0x28] sm:$0xff] }
  0x23   :  { %369 = vmatprep.subr.mxu0 %v495_v0  ;;  %380 = vmatprep.subr.mxu1 %v495_v0  ;;  %v234_v22 = vld [vmem:[%s637_s5 + $0x20] sm:$0xff]  ;;  %v233_v23 = vld [vmem:[%s637_s5 + $0x18] sm:$0xff]  ;;  %v232_v24 = vld [vmem:[%s637_s5 + $0x10] sm:$0xff] }
  0x24   :  { %370 = vmatpush3.msra.mxu0 %v55_v3  ;;  %381 = vmatpush3.msra.mxu1 %v145_v8  ;;  %v231_v25 = vld [vmem:[%s637_s5 + $0x8] sm:$0xff]  ;;  %v230_v26 = vld [vmem:[%s637_s5] sm:$0xff]  ;;  %s465_s5 = scalar_lea.vmem %s327_s22, 128 }
  0x25   :  { %371 = vmatprep.subr.mxu0 %v495_v0  ;;  %382 = vmatprep.subr.mxu1 %v495_v0  ;;  %v338_v27 = vld [vmem:[#allocation5] ss:$0 sm:$0xff]  ;;  %p466_p10 = scmp.ne.s32.totalorder %s327_s22, %s465_s5  ;;  %p471_p12 = scmp.lt.s32.totalorder %s465_s5, %s465_s5 }
  0x26   :  { %372 = vmatpush3.msra.mxu0 %v54_v4  ;;  %383 = vmatpush3.msra.mxu1 %v144_v9  ;;  %v340_v32 = vld [vmem:[%s638_s6] ss:$0 sm:$0xff] }
  0x27   :  { %374 = vmatmul.mubr.msk.f32.vlgmr.msra.gmra.mxu0 %vm65_vm1, %v53_v5  ;;  %395 = vmatprep.subr.mxu0 %v495_v0  ;;  %p472_p13 = por %p471_p12, %p470_p11 }
  0x28   :  { %411 = vmatprep.mubr.msk.f32.mxu0 %vm496_vm0, %v495_v0  ;;  %384 = vmatprep.subr.mxu1 %v495_v0 }
  0x29   :  { %385 = vmatpush3.msra.mxu1 %v143_v10  ;;  %396 = vmatpush3.msra.mxu0 %v237_v19  ;;  %p473_p0 = pnand %p472_p13, %p466_p10 }
  0x2a   :  { %386 = vmatprep.subr.mxu1 %v495_v0  ;;  %397 = vmatprep.subr.mxu0 %v495_v0 }
  0x2b   :  { %387 = vmatpush3.msra.mxu1 %v142_v11  ;;  %398 = vmatpush3.msra.mxu0 %v236_v20 }
  0x2c   :  { %388 = vmatprep.subr.mxu1 %v495_v0  ;;  %399 = vmatprep.subr.mxu0 %v495_v0 }
  0x2d   :  { %389 = vmatpush3.msra.mxu1 %v141_v12  ;;  %400 = vmatpush3.msra.mxu0 %v235_v21 }
  0x2e   :  { %390 = vmatprep.subr.mxu1 %v495_v0  ;;  %401 = vmatprep.subr.mxu0 %v495_v0 }
  0x2f   :  { %391 = vmatpush3.msra.mxu1 %v140_v13  ;;  %402 = vmatpush3.msra.mxu0 %v234_v22 }
  0x30   :  { %403 = vmatprep.subr.mxu0 %v495_v0 }
  0x31   :  { %404 = vmatpush3.msra.mxu0 %v233_v23 }
  0x32   :  { %405 = vmatprep.subr.mxu0 %v495_v0 }
  0x33   :  { %406 = vmatpush3.msra.mxu0 %v232_v24 }
  0x34   :  { %407 = vmatprep.subr.mxu0 %v495_v0 }
  0x35   :  { %408 = vmatpush3.msra.mxu0 %v231_v25 }
  0x36   :  { %409 = vmatprep.subr.mxu0 %v495_v0 }
  0x37   :  { %410 = vmatpush3.msra.mxu0 %v230_v26 }
  0xe7   :  { %v135_v15 = vpop.f32.mrf.mxu0 }
  0xe8   :  { %v136_v16 = vadd.f32 %v336_v14, %v135_v15 }
  0xe9   :  { %v375_v17 = vpop.f32.mrf.mxu0 }
  0xea   :  { %421 = vtanh.f32 %v136_v16 }
  0xf7   :  { %v422_v18 = vpop.eup %421 }
  0xf8   :  { %393 = vmatmul.mubr.msk.f32.vlgmr.msra.gmra.mxu1 %vm155_vm2, %v422_v18 }
 0x1b8   :  { %v225_v28 = vpop.f32.mrf.mxu1 }
 0x1b9   :  { %v226_v29 = vadd.f32 %v338_v27, %v225_v28 }
 0x1ba   :  { %v394_v30 = vpop.f32.mrf.mxu1 }
 0x1bb   :  { %423 = vtanh.f32 %v226_v29 }
 0x1c8   :  { %v424_v31 = vpop.eup %423 }
 0x1c9   :  { %412 = vmatmul.mubr.msk.f32.vlgmr.msra.gmra.mxu0 %vm155_vm2, %v424_v31 }
 0x289   :  { %v314_v33 = vpop.f32.mrf.mxu0 }
 0x28a   :  { %v315_v34 = vadd.f32 %v340_v32, %v314_v33 }
 0x28b   :  { %v413_v35 = vpop.f32.mrf.mxu0 }
 0x28c   :  { %319 = vst.msk [vmem:[#allocation7] sm:$0xff] %vm318_vm3, %v315_v34 }
 0x28d   :  { %476 = shalt.err (!%p473_p0)
}
 0x28e   :  { %329 = dma.vmem_to_hbm [thread:$0]  %s327_s22, 128, %s639_s7, [#allocation4]  }
 0x28f   :  { %489 = dma.done.wait [#allocation4], 128  }
 0x290   :  { %490 = vsyncadd [#allocation4], 4294967168 }
 0x291   :  { %333 = vsyncpa [#allocation3], 1 }
 0x292   :  { %334 = vsyncpa [#allocation6], 1 }
 0x293   :  { %335 = vsyncpa [#allocation4], 1 }

</bundles_post_ra>
